<compile_context>
chip_gen: v7x
topology: tpu7x:2x2x1
jax: 0.10.0
libtpu: 0.0.40
codegen_flags: <defaults>
</compile_context>

<pallas_src>
import functools

import jax
import jax.numpy as jnp
from jax.experimental import pallas as pl
from jax.experimental.pallas import tpu as pltpu

_LANE = 128


# ----------------------------------------------------------------------------- kernel
def _channel_attn_kernel(x_ref, w1_ref, w2_ref, o_ref, sum_sc, max_sc,
                         *, hw, tile, need_mask):
    """One (batch, spatial-tile) grid step.

    x_ref : (1, C, T)   NCHW tile, H*W on the 128-lane axis
    w1_ref: (Cr, C)     torch conv1.weight[:, :, 0, 0]
    w2_ref: (C, Cr)     torch conv2.weight[:, :, 0, 0]
    o_ref : (1, C, 1)   sigmoid channel-attention weights for this image
    sum_sc: (C, 128) f32      per-lane running sum over spatial tiles
    max_sc: (C, 128) x.dtype  per-lane running max over spatial tiles
    """
    t = pl.program_id(1)
    nt = pl.num_programs(1)
    n_chunks = tile // _LANE

    def partials(masked):
        # Per-lane partial reduction of this tile: T -> 128 lanes, pure VPU work
        # on lane-dense vregs (no cross-lane movement, no full-tile upcast).
        local_sum = None
        local_max = None
        for k in range(n_chunks):
            chunk = x_ref[0, :, k * _LANE:(k + 1) * _LANE]          # (C, 128)
            if masked:
                pos = (t * tile + k * _LANE
                       + jax.lax.broadcasted_iota(jnp.int32, chunk.shape, 1))
                valid = pos < hw
                csum = jnp.where(valid, chunk, jnp.zeros_like(chunk))
                cmax = jnp.where(valid, chunk,
                                 jnp.full(chunk.shape, -jnp.inf, chunk.dtype))
            else:
                csum = chunk
                cmax = chunk
            csum = csum.astype(jnp.float32)
            if local_sum is None:
                local_sum, local_max = csum, cmax
            else:
                local_sum = local_sum + csum
                local_max = jnp.maximum(local_max, cmax)
        return local_sum, local_max

    def merge(local_sum, local_max):
        sum_sc[...] = sum_sc[...] + local_sum
        max_sc[...] = jnp.maximum(max_sc[...], local_max)

    @pl.when(t == 0)
    def _():
        sum_sc[...] = jnp.zeros(sum_sc.shape, sum_sc.dtype)
        max_sc[...] = jnp.full(max_sc.shape, -jnp.inf, max_sc.dtype)

    if need_mask:
        @pl.when(t == nt - 1)
        def _():
            merge(*partials(True))

        @pl.when(t != nt - 1)
        def _():
            merge(*partials(False))
    else:
        merge(*partials(False))

    @pl.when(t == nt - 1)
    def _():
        # One cross-lane reduce per image, then the tiny shared MLP + sigmoid.
        avg = jnp.sum(sum_sc[...], axis=1, keepdims=True) * (1.0 / hw)     # (C, 1)
        mx = jnp.max(max_sc[...].astype(jnp.float32), axis=1, keepdims=True)
        w1 = w1_ref[...].astype(jnp.float32)                               # (Cr, C)
        w2 = w2_ref[...].astype(jnp.float32)                               # (C, Cr)

        def mlp(v):                                                        # (C,1)->(C,1)
            h = jnp.maximum(
                jnp.dot(w1, v, preferred_element_type=jnp.float32), 0.0)
            return jnp.dot(w2, h, preferred_element_type=jnp.float32)

        att = jax.nn.sigmoid(mlp(avg) + mlp(mx))                           # (C, 1)
        o_ref[0] = att.astype(o_ref.dtype)


# ----------------------------------------------------------------------------- wrapper
def channel_attention(x_nchw, w1, w2):
    """ChannelAttentionModule.forward.

    x_nchw: (N, C, H, W)   input feature map (native PyTorch layout, no transpose).
    w1:     (Cr, C)  == torch Conv2d(C, Cr, 1, bias=False).weight[:, :, 0, 0]
    w2:     (C, Cr)  == torch Conv2d(Cr, C, 1, bias=False).weight[:, :, 0, 0]
    Returns (N, C, 1, 1) sigmoid attention weights (input dtype).
    """
    N, C, H, W = x_nchw.shape
    Cr = w1.shape[0]
    assert w1.shape == (Cr, C) and w2.shape == (C, Cr)

    HW = H * W
    x = x_nchw.reshape(N, C, HW)                 # free reshape (row-major), no HBM copy
    itemsize = jnp.dtype(x.dtype).itemsize

    # H*W < 128: pad the lane axis to one full lane group (tiny tensors only).
    if HW < _LANE:
        x = jnp.pad(x, ((0, 0), (0, 0), (0, _LANE - HW)))
        hw_arr = _LANE
    else:
        hw_arr = HW

    # Lane-dense spatial tile: multiple of 128, <= array extent, ~2 MiB cap.
    cap_elems = max(_LANE, (2 * 1024 * 1024) // (C * itemsize))
    cap_elems = min(cap_elems, 8192)
    T = max(_LANE, min((cap_elems // _LANE) * _LANE, (hw_arr // _LANE) * _LANE))
    n_tiles = pl.cdiv(hw_arr, T)
    need_mask = (hw_arr % T != 0) or (hw_arr != HW)

    kernel = functools.partial(_channel_attn_kernel, hw=HW, tile=T,
                               need_mask=need_mask)

    cost = pl.CostEstimate(
        flops=2 * N * HW * C + 8 * N * C * Cr,
        transcendentals=N * C,
        bytes_accessed=N * C * HW * itemsize + 2 * C * Cr * 4 + N * C * itemsize,
    )

    out = pl.pallas_call(
        kernel,
        out_shape=jax.ShapeDtypeStruct((N, C, 1), x.dtype),
        grid=(N, n_tiles),
        in_specs=[
            pl.BlockSpec((1, C, T), lambda n, t: (n, 0, t)),
            pl.BlockSpec((Cr, C), lambda n, t: (0, 0)),
            pl.BlockSpec((C, Cr), lambda n, t: (0, 0)),
        ],
        out_specs=pl.BlockSpec((1, C, 1), lambda n, t: (n, 0, 0)),
        scratch_shapes=[
            pltpu.VMEM((C, _LANE), jnp.float32),   # per-lane running sum (f32)
            pltpu.VMEM((C, _LANE), x.dtype),       # per-lane running max (native)
        ],
        compiler_params=pltpu.CompilerParams(
            dimension_semantics=("parallel", "arbitrary"),
            vmem_limit_bytes=32 * 1024 * 1024,
        ),
        cost_estimate=cost,
    )(x, w1, w2)

    return out.reshape(N, C, 1, 1)


# ----------------------------------------------------------------------------- reference
def channel_attention_ref(x_nchw, w1, w2):
    xf = x_nchw.astype(jnp.float32)
    avg = jnp.mean(xf, axis=(2, 3))               # (N, C)
    mx = jnp.max(xf, axis=(2, 3))                 # (N, C)

    def mlp(v):                                   # torch-layout weights
        return jnp.maximum(v @ w1.T.astype(jnp.float32), 0.0) @ w2.T.astype(jnp.float32)

    out = jax.nn.sigmoid(mlp(avg) + mlp(mx))
    N, C = out.shape
    return out.reshape(N, C, 1, 1).astype(x_nchw.dtype)


# ----------------------------------------------------------------------------- main
if __name__ == "__main__":
    channel = 64        # mmocr tps_pp uses num_channels=64
    ratio = 16
    Cr = channel // ratio

    key = jax.random.PRNGKey(0)
    kx1, kx2, kx3, k1, k2 = jax.random.split(key, 5)
    # Bias-free 1x1 convs of the shared MLP, stored in native torch layout.
    w1 = 0.1 * jax.random.normal(k1, (Cr, channel), jnp.float32)   # (Cr, C)
    w2 = 0.1 * jax.random.normal(k2, (channel, Cr), jnp.float32)   # (C, Cr)

    fwd = jax.jit(channel_attention)

    def check(x):
        out = fwd(x, w1, w2)
        jax.block_until_ready(out)
        assert out.shape == (x.shape[0], x.shape[1], 1, 1), out.shape
        ref = channel_attention_ref(x, w1, w2)
        assert bool(jnp.all(jnp.isfinite(out)))
        err = float(jnp.max(jnp.abs(out.astype(jnp.float32) - ref.astype(jnp.float32))))
        assert err < 1e-5, err

    # 1) Main case: H*W multiple of 128, single unmasked tile.
    check(jax.random.normal(kx1, (2, channel, 16, 16), jnp.float32))
    # 2) Ragged case: H*W = 130 -> two tiles, masked last tile.
    check(jax.random.normal(kx2, (2, channel, 10, 13), jnp.float32))
    # 3) Tiny case: H*W = 36 < 128 -> padded + masked single tile.
    check(jax.random.normal(kx3, (2, channel, 6, 6), jnp.float32))

    print("KERNEL_OK")
</pallas_src>

<mosaic_0001>
module attributes {stable_mosaic.version = 11 : i64} {
  func.func @_channel_attn_kernel(%arg0: i32, %arg1: i32, %arg2: memref<1x64x256xf32, #tpu.memory_space<vmem>>, %arg3: memref<4x64xf32, #tpu.memory_space<vmem>>, %arg4: memref<64x4xf32, #tpu.memory_space<vmem>>, %arg5: memref<1x64x1xf32, #tpu.memory_space<vmem>>, %arg6: memref<64x128xf32, #tpu.memory_space<vmem>>, %arg7: memref<64x128xf32, #tpu.memory_space<vmem>>) attributes {dimension_semantics = [#tpu.dimension_semantics<parallel>, #tpu.dimension_semantics<arbitrary>], iteration_bounds = array<i64: 2, 1>, scalar_prefetch = 0 : i64, scratch_operands = 2 : i64, tpu.core_type = #tpu.core_type<tc>, window_params = [{transform_indices = @transform_0, window_bounds = array<i64: 1, 64, 256>}, {pipeline_mode = #tpu.pipeline_mode<synchronous>, transform_indices = @transform_1, window_bounds = array<i64: 4, 64>}, {pipeline_mode = #tpu.pipeline_mode<synchronous>, transform_indices = @transform_2, window_bounds = array<i64: 64, 4>}, {transform_indices = @transform_3, window_bounds = array<i64: 1, 64, 1>}]} {
    %c0_i32 = arith.constant 0 : i32
    %0 = arith.cmpi eq, %arg1, %c0_i32 : i32
    %1 = arith.extui %0 : i1 to i32
    %c0_i32_0 = arith.constant 0 : i32
    %2 = arith.cmpi ne, %1, %c0_i32_0 : i32
    scf.if %2 {
      %cst = arith.constant 0.000000e+00 : f32
      %18 = vector.broadcast %cst : f32 to vector<64x128xf32>
      %c0_15 = arith.constant 0 : index
      %c0_16 = arith.constant 0 : index
      %19 = vector.load %arg6[%c0_15, %c0_16] : memref<64x128xf32, #tpu.memory_space<vmem>>, vector<64x128xf32>
      tpu.vector_store %arg6[%c0_15, %c0_16], %18 {strides = array<i32>} : memref<64x128xf32, #tpu.memory_space<vmem>>, vector<64x128xf32>,
      %cst_17 = arith.constant 0xFF800000 : f32
      %20 = vector.broadcast %cst_17 : f32 to vector<64x128xf32>
      %c0_18 = arith.constant 0 : index
      %c0_19 = arith.constant 0 : index
      %21 = vector.load %arg7[%c0_18, %c0_19] : memref<64x128xf32, #tpu.memory_space<vmem>>, vector<64x128xf32>
      tpu.vector_store %arg7[%c0_18, %c0_19], %20 {strides = array<i32>} : memref<64x128xf32, #tpu.memory_space<vmem>>, vector<64x128xf32>,
    } else {
    }
    %c0 = arith.constant 0 : index
    %c0_1 = arith.constant 0 : index
    %c0_2 = arith.constant 0 : index
    %3 = vector.load %arg2[%c0, %c0_1, %c0_2] : memref<1x64x256xf32, #tpu.memory_space<vmem>>, vector<1x64x128xf32>
    %4 = vector.shape_cast %3 : vector<1x64x128xf32> to vector<64x128xf32>
    %c0_3 = arith.constant 0 : index
    %c0_4 = arith.constant 0 : index
    %c128 = arith.constant 128 : index
    %5 = vector.load %arg2[%c0_3, %c0_4, %c128] : memref<1x64x256xf32, #tpu.memory_space<vmem>>, vector<1x64x128xf32>
    %6 = vector.shape_cast %5 : vector<1x64x128xf32> to vector<64x128xf32>
    %7 = arith.addf %4, %6 : vector<64x128xf32>
    %8 = arith.maximumf %4, %6 : vector<64x128xf32>
    %c0_5 = arith.constant 0 : index
    %c0_6 = arith.constant 0 : index
    %9 = vector.load %arg6[%c0_5, %c0_6] : memref<64x128xf32, #tpu.memory_space<vmem>>, vector<64x128xf32>
    %10 = arith.addf %9, %7 : vector<64x128xf32>
    %c0_7 = arith.constant 0 : index
    %c0_8 = arith.constant 0 : index
    %11 = vector.load %arg6[%c0_7, %c0_8] : memref<64x128xf32, #tpu.memory_space<vmem>>, vector<64x128xf32>
    tpu.vector_store %arg6[%c0_7, %c0_8], %10 {strides = array<i32>} : memref<64x128xf32, #tpu.memory_space<vmem>>, vector<64x128xf32>,
    %c0_9 = arith.constant 0 : index
    %c0_10 = arith.constant 0 : index
    %12 = vector.load %arg7[%c0_9, %c0_10] : memref<64x128xf32, #tpu.memory_space<vmem>>, vector<64x128xf32>
    %13 = arith.maximumf %12, %8 : vector<64x128xf32>
    %c0_11 = arith.constant 0 : index
    %c0_12 = arith.constant 0 : index
    %14 = vector.load %arg7[%c0_11, %c0_12] : memref<64x128xf32, #tpu.memory_space<vmem>>, vector<64x128xf32>
    tpu.vector_store %arg7[%c0_11, %c0_12], %13 {strides = array<i32>} : memref<64x128xf32, #tpu.memory_space<vmem>>, vector<64x128xf32>,
    %c0_i32_13 = arith.constant 0 : i32
    %15 = arith.cmpi eq, %arg1, %c0_i32_13 : i32
    %16 = arith.extui %15 : i1 to i32
    %c0_i32_14 = arith.constant 0 : i32
    %17 = arith.cmpi ne, %16, %c0_i32_14 : i32
    scf.if %17 {
      %c0_15 = arith.constant 0 : index
      %c0_16 = arith.constant 0 : index
      %18 = vector.load %arg6[%c0_15, %c0_16] : memref<64x128xf32, #tpu.memory_space<vmem>>, vector<64x128xf32>
      %cst = arith.constant dense<0.000000e+00> : vector<64xf32>
      %19 = vector.multi_reduction <add>, %18, %cst [1] : vector<64x128xf32> to vector<64xf32>
      %20 = vector.shape_cast %19 : vector<64xf32> to vector<64x1xf32>
      %cst_17 = arith.constant 3.906250e-03 : f32
      %21 = vector.broadcast %cst_17 : f32 to vector<64x1xf32>
      %22 = arith.mulf %20, %21 : vector<64x1xf32>
      %c0_18 = arith.constant 0 : index
      %c0_19 = arith.constant 0 : index
      %23 = vector.load %arg7[%c0_18, %c0_19] : memref<64x128xf32, #tpu.memory_space<vmem>>, vector<64x128xf32>
      %cst_20 = arith.constant dense<0xFF800000> : vector<64xf32>
      %24 = vector.multi_reduction <maximumf>, %23, %cst_20 [1] : vector<64x128xf32> to vector<64xf32>
      %25 = vector.shape_cast %24 : vector<64xf32> to vector<64x1xf32>
      %c0_21 = arith.constant 0 : index
      %c0_22 = arith.constant 0 : index
      %26 = vector.load %arg3[%c0_21, %c0_22] : memref<4x64xf32, #tpu.memory_space<vmem>>, vector<4x64xf32>
      %c0_23 = arith.constant 0 : index
      %c0_24 = arith.constant 0 : index
      %27 = vector.load %arg4[%c0_23, %c0_24] : memref<64x4xf32, #tpu.memory_space<vmem>>, vector<64x4xf32>
      %cst_25 = arith.constant dense<0.000000e+00> : vector<4x1xf32>
      %28 = tpu.matmul %26, %22, %cst_25 {dimension_numbers = #tpu.dot_dimension_numbers<[1], [0], [0], [1], [0, 0, 1, 1], [], []>} : vector<4x64xf32>, vector<64x1xf32>, vector<4x1xf32> -> vector<4x1xf32>
      %cst_26 = arith.constant 0.000000e+00 : f32
      %29 = vector.broadcast %cst_26 : f32 to vector<4x1xf32>
      %30 = arith.maximumf %28, %29 : vector<4x1xf32>
      %cst_27 = arith.constant dense<0.000000e+00> : vector<64x1xf32>
      %31 = tpu.matmul %27, %30, %cst_27 {dimension_numbers = #tpu.dot_dimension_numbers<[1], [0], [0], [1], [0, 0, 1, 1], [], []>} : vector<64x4xf32>, vector<4x1xf32>, vector<64x1xf32> -> vector<64x1xf32>
      %cst_28 = arith.constant dense<0.000000e+00> : vector<4x1xf32>
      %32 = tpu.matmul %26, %25, %cst_28 {dimension_numbers = #tpu.dot_dimension_numbers<[1], [0], [0], [1], [0, 0, 1, 1], [], []>} : vector<4x64xf32>, vector<64x1xf32>, vector<4x1xf32> -> vector<4x1xf32>
      %cst_29 = arith.constant 0.000000e+00 : f32
      %33 = vector.broadcast %cst_29 : f32 to vector<4x1xf32>
      %34 = arith.maximumf %32, %33 : vector<4x1xf32>
      %cst_30 = arith.constant dense<0.000000e+00> : vector<64x1xf32>
      %35 = tpu.matmul %27, %34, %cst_30 {dimension_numbers = #tpu.dot_dimension_numbers<[1], [0], [0], [1], [0, 0, 1, 1], [], []>} : vector<64x4xf32>, vector<4x1xf32>, vector<64x1xf32> -> vector<64x1xf32>
      %36 = arith.addf %31, %35 : vector<64x1xf32>
      %37 = arith.negf %36 : vector<64x1xf32>
      %38 = math.exp %37 : vector<64x1xf32>
      %cst_31 = arith.constant 1.000000e+00 : f32
      %39 = vector.broadcast %cst_31 : f32 to vector<64x1xf32>
      %40 = arith.addf %39, %38 : vector<64x1xf32>
      %41 = arith.divf %39, %40 : vector<64x1xf32>
      %c0_32 = arith.constant 0 : index
      %c0_33 = arith.constant 0 : index
      %c0_34 = arith.constant 0 : index
      %42 = vector.load %arg5[%c0_32, %c0_33, %c0_34] : memref<1x64x1xf32, #tpu.memory_space<vmem>>, vector<1x64x1xf32>
      %43 = vector.shape_cast %42 : vector<1x64x1xf32> to vector<64x1xf32>
      %44 = vector.shape_cast %41 : vector<64x1xf32> to vector<1x64x1xf32>
      tpu.vector_store %arg5[%c0_32, %c0_33, %c0_34], %44 {strides = array<i32>} : memref<1x64x1xf32, #tpu.memory_space<vmem>>, vector<1x64x1xf32>,
    } else {
    }
    return
  }
  func.func @transform_0(%arg0: i32, %arg1: i32) -> (i32, i32, i32) {
    %c0_i32 = arith.constant 0 : i32
    %c0_i32_0 = arith.constant 0 : i32
    return %arg0, %c0_i32, %arg1 : i32, i32, i32
  }
  func.func @transform_1(%arg0: i32, %arg1: i32) -> (i32, i32) {
    %c0_i32 = arith.constant 0 : i32
    %c0_i32_0 = arith.constant 0 : i32
    %c0_i32_1 = arith.constant 0 : i32
    return %c0_i32, %c0_i32_0 : i32, i32
  }
  func.func @transform_2(%arg0: i32, %arg1: i32) -> (i32, i32) {
    %c0_i32 = arith.constant 0 : i32
    %c0_i32_0 = arith.constant 0 : i32
    %c0_i32_1 = arith.constant 0 : i32
    return %c0_i32, %c0_i32_0 : i32, i32
  }
  func.func @transform_3(%arg0: i32, %arg1: i32) -> (i32, i32, i32) {
    %c0_i32 = arith.constant 0 : i32
    %c0_i32_0 = arith.constant 0 : i32
    %c0_i32_1 = arith.constant 0 : i32
    return %arg0, %c0_i32, %c0_i32_0 : i32, i32, i32
  }
}

</mosaic_0001>

<bundles_post_ra>
// kernel: channel_attention.1
= control target key start
LH: loop header
LB: loop body
LE: loop exit
PB: predicated region body
PF: predicated region fallthrough
CT: control target
= control target key end

     0   :  { %s1162_s12 = smov 0   ;;  %s1164_s13 = smov 0   ;;  %s1254_s0 = inlined_call_operand.vmem [shape: f32[2,64,256], index: 0, kind: input, shape index: {}]   ;;  %s1255_s1 = inlined_call_operand.vmem [shape: f32[4,64], index: 1, kind: input, shape index: {}]   ;;  %s1256_s2 = inlined_call_operand.vmem [shape: f32[64,4], index: 2, kind: input, shape index: {}]   ;;  %s1257_s3 = inlined_call_operand.vmem [shape: f32[2,64,1], index: 3, kind: output, shape index: {}]  }
   0x1   :  { %s1166_s14 = smov 0  }
   0x2 LB: > { %s25_s15 = sadd.s32 1, %s1133_s13  ;;  %p885_p0 = scmp.ge.s32.totalorder %s1137_s14, 1  ;;  %s1137_s14 = sphi %s1166_s14, %s13_s14   ;;  %s1133_s13 = sphi %s1164_s13, %s1259_s13   ;;  %s1129_s12 = sphi %s1162_s12, %s1258_s12  }
   0x3   : > { %p27_p1 = scmp.ge.s32.totalorder %s25_s15, 2  ;;  %p156_p2 = scmp.lt.s32.totalorder %s1137_s14, 3 }
   0x5   : > { %s1261_s15 = smov (%p27_p1, %s25_s15), 0  ;;  %p157_p3 = pnand %p885_p0, %p156_p2 }
   0x6   : > { %p185_p4 = scmp.lt.s32.totalorder (!%p157_p3), %s1129_s12, 1  ;;  %v1139_v30 = vmov (!%p157_p3), 0.0|0.0   ;;  %vm1140_vm0 = vmmov (!%p157_p3), 0   ;;  %v1141_v33 = vmov (!%p157_p3), 0.0   ;;  %v358_v59 = vld [vmem:[%s1255_s1] sm:$0xf] (!%p157_p3) }
   0x7   : > { %160 = sbr.rel (%p157_p3) target bundleno = 688 (0x2b0), region = 32  ;;  %1024 = vmatprep.subr.bf16.mxu1 (!%p157_p3), %v1139_v30  ;;  %974 = vmatprep.mubr.msk.f32.mxu1 (!%p157_p3), %vm1140_vm0, %v1141_v33  ;;  %vm367_vm1 = vcmask (!%p157_p3), 523264   ;;  %vm513_vm2 = vcmask (!%p157_p3), 31744   ;;  %vm538_vm3 = vcmask (!%p157_p3), 1043456   ;;  %vm803_vm4 = vcmask (!%p157_p3), 7168  }
   0xe   : > { %s1263_s12 = smov (!%p185_p4, %s1129_s12), 1 }
   0xf   : > { %s920_s16 = sshll.u32 %s1263_s12, 7  ;;  %s921_s11 = sshll.u32 %s1263_s12, 6 }
  0x10   : > { %s192_s19 = scalar_lea.vmem %s1254_s0, %s920_s16  ;;  %s198_s18 = scalar_lea.vmem %s1257_s3, %s921_s11 }
  0x11   : > { %v221_v0 = vld [vmem:[%s192_s19 + $0x20] sm:$0xff]  ;;  %v229_v1 = vld [vmem:[%s192_s19 + $0x28] sm:$0xff]  ;;  %v222_v5 = vld [vmem:[%s192_s19 + $0x30] sm:$0xff] }
  0x12   : > { %v219_v2 = vld [vmem:[%s192_s19] sm:$0xff]  ;;  %v237_v3 = vadd.f32 %v229_v1, %v221_v0  ;;  %v227_v4 = vld [vmem:[%s192_s19 + $0x8] sm:$0xff]  ;;  %v230_v6 = vld [vmem:[%s192_s19 + $0x38] sm:$0xff]  ;;  %v245_v27 = vmax.f32 %v221_v0, %v229_v1 }
  0x13   : > { %v235_v7 = vadd.f32 %v227_v4, %v219_v2  ;;  %v220_v8 = vld [vmem:[%s192_s19 + $0x10] sm:$0xff]  ;;  %v228_v9 = vld [vmem:[%s192_s19 + $0x18] sm:$0xff]  ;;  %v238_v10 = vadd.f32 %v230_v6, %v222_v5  ;;  %v223_v14 = vld [vmem:[%s192_s19 + $0x40] sm:$0xff]  ;;  %v243_v25 = vmax.f32 %v219_v2, %v227_v4  ;;  %v246_v26 = vmax.f32 %v222_v5, %v230_v6 }
  0x14   : > { %314 = vadd.xlane.f32.xlu1 %v237_v3  ;;  %v236_v11 = vadd.f32 %v228_v9, %v220_v8  ;;  %v224_v12 = vld [vmem:[%s192_s19 + $0x50] sm:$0xff]  ;;  %v232_v13 = vld [vmem:[%s192_s19 + $0x58] sm:$0xff]  ;;  %v231_v15 = vld [vmem:[%s192_s19 + $0x48] sm:$0xff]  ;;  %v244_v24 = vmax.f32 %v220_v8, %v228_v9 }
  0x15   : > { %310 = vadd.xlane.f32.xlu0 %v235_v7  ;;  %v240_v16 = vadd.f32 %v232_v13, %v224_v12  ;;  %v239_v17 = vadd.f32 %v231_v15, %v223_v14  ;;  %v226_v18 = vld [vmem:[%s192_s19 + $0x70] sm:$0xff]  ;;  %v234_v19 = vld [vmem:[%s192_s19 + $0x78] sm:$0xff]  ;;  %v225_v20 = vld [vmem:[%s192_s19 + $0x60] sm:$0xff]  ;;  %v248_v28 = vmax.f32 %v224_v12, %v232_v13  ;;  %v247_v29 = vmax.f32 %v223_v14, %v231_v15 }
  0x16   : > { %v233_v21 = vld [vmem:[%s192_s19 + $0x68] sm:$0xff]  ;;  %v242_v22 = vadd.f32 %v234_v19, %v226_v18  ;;  %v250_v31 = vmax.f32 %v226_v18, %v234_v19  ;;  %v359_v3 = vld [vmem:[%s1256_s2] sm:$0xff]  ;;  %v362_v12 = vld [vmem:[%s1256_s2 + $0x18] sm:$0xff] }
  0x17   : > { %v241_v23 = vadd.f32 %v233_v21, %v225_v20  ;;  %v249_v32 = vmax.f32 %v225_v20, %v233_v21  ;;  %998 = vmatprep.mubr.msk.f32.mxu0 %vm513_vm2, %v359_v3  ;;  %v360_v9 = vld [vmem:[%s1256_s2 + $0x8] sm:$0xff]  ;;  %v363_v13 = vld [vmem:[%s1256_s2 + $0x20] sm:$0xff]  ;;  %v365_v15 = vld [vmem:[%s1256_s2 + $0x30] sm:$0xff] }
  0x18   : > { %316 = vadd.xlane.f32.xlu1 %v238_v10  ;;  %v364_v14 = vld [vmem:[%s1256_s2 + $0x28] sm:$0xff] }
  0x19   : > { %312 = vadd.xlane.f32.xlu0 %v236_v11  ;;  %v361_v11 = vld [vmem:[%s1256_s2 + $0x10] sm:$0xff] }
  0x1c   : > { %320 = vadd.xlane.f32.xlu1 %v240_v16  ;;  %v366_v16 = vld [vmem:[%s1256_s2 + $0x38] sm:$0xff] }
  0x1d   : > { %318 = vadd.xlane.f32.xlu0 %v239_v17 }
  0x20   : > { %324 = vadd.xlane.f32.xlu1 %v242_v22 }
  0x21   : > { %322 = vadd.xlane.f32.xlu0 %v241_v23 }
  0x24   : > { %344 = vmax.xlane.f32.xlu1 %v244_v24 }
  0x25   : > { %342 = vmax.xlane.f32.xlu0 %v243_v25 }
  0x28   : > { %348 = vmax.xlane.f32.xlu1 %v246_v26 }
  0x29   : > { %346 = vmax.xlane.f32.xlu0 %v245_v27 }
  0x2c   : > { %352 = vmax.xlane.f32.xlu1 %v248_v28 }
  0x2d   : > { %350 = vmax.xlane.f32.xlu0 %v247_v29 }
  0x30   : > { %356 = vmax.xlane.f32.xlu1 %v250_v31 }
  0x31   : > { %354 = vmax.xlane.f32.xlu0 %v249_v32 }
  0xa1   : > { %v315_v34 = vpop.xlane.xlu1 %314 }
  0xa2   : > { %v311_v35 = vpop.xlane.xlu0 %310  ;;  %v328_v40 = vmul.f32 0.00390625, %v315_v34 }
  0xa3   : > { %v326_v38 = vmul.f32 0.00390625, %v311_v35 }
  0xa5   : > { %v317_v36 = vpop.xlane.xlu1 %316 }
  0xa6   : > { %v313_v37 = vpop.xlane.xlu0 %312  ;;  %v329_v41 = vmul.f32 0.00390625, %v317_v36 }
  0xa7   : > { %v327_v39 = vmul.f32 0.00390625, %v313_v37 }
  0xa8   : > { %v1028_v47 = vpack.c.bf16 %v329_v41, %v328_v40 }
  0xa9   : > { %v1025_v42 = vpack.c.bf16 %v327_v39, %v326_v38  ;;  %v321_v43 = vpop.xlane.xlu1 %320 }
  0xaa   : > { %v319_v44 = vpop.xlane.xlu0 %318  ;;  %v331_v45 = vmul.f32 0.00390625, %v321_v43 }
  0xab   : > { %1026 = vmatpush3.bf16.msra.mxu1 %v1025_v42  ;;  %v330_v46 = vmul.f32 0.00390625, %v319_v44 }
  0xac   : > { %1027 = vmatprep.subr.bf16.mxu1 %v1139_v30 }
  0xad   : > { %v325_v48 = vpop.xlane.xlu1 %324  ;;  %v1031_v50 = vpack.c.bf16 %v331_v45, %v330_v46 }
  0xae   : > { %v323_v49 = vpop.xlane.xlu0 %322  ;;  %v333_v51 = vmul.f32 0.00390625, %v325_v48 }
  0xaf   : > { %1029 = vmatpush3.bf16.msra.mxu1 %v1028_v47  ;;  %v332_v52 = vmul.f32 0.00390625, %v323_v49 }
  0xb0   : > { %1030 = vmatprep.subr.bf16.mxu1 %v1139_v30 }
  0xb1   : > { %v345_v53 = vpop.xlane.xlu1 %344  ;;  %v1034_v55 = vpack.c.bf16 %v333_v51, %v332_v52 }
  0xb2   : > { %v343_v54 = vpop.xlane.xlu0 %342 }
  0xb3   : > { %1032 = vmatpush3.bf16.msra.mxu1 %v1031_v50  ;;  %v1037_v58 = vpack.c.bf16 %v345_v53, %v343_v54 }
  0xb4   : > { %1033 = vmatprep.subr.bf16.mxu1 %v1139_v30 }
  0xb5   : > { %v349_v56 = vpop.xlane.xlu1 %348 }
  0xb6   : > { %v347_v57 = vpop.xlane.xlu0 %346 }
  0xb7   : > { %1035 = vmatpush3.bf16.msra.mxu1 %v1034_v55  ;;  %v1040_v62 = vpack.c.bf16 %v349_v56, %v347_v57 }
  0xb8   : > { %1036 = vmatprep.subr.bf16.mxu1 %v1139_v30 }
  0xb9   : > { %v353_v60 = vpop.xlane.xlu1 %352 }
  0xba   : > { %975 = vmatmul.mubr.msk.f32.vlgmr.msra.gmra.mrb[0].mxu1 %vm367_vm1, %v358_v59  ;;  %v351_v61 = vpop.xlane.xlu0 %350 }
  0xbb   : > { %1038 = vmatpush3.bf16.msra.mxu1 %v1037_v58  ;;  %993 = vmatprep.mubr.msk.f32.mxu1 %vm1140_vm0, %v1141_v33  ;;  %v1043_v63 = vpack.c.bf16 %v353_v60, %v351_v61 }
  0xbc   : > { %1039 = vmatprep.subr.bf16.mxu1 %v1139_v30 }
  0xbd   : > { %v357_v0 = vpop.xlane.xlu1 %356 }
  0xbe   : > { %v355_v1 = vpop.xlane.xlu0 %354 }
  0xbf   : > { %1041 = vmatpush3.bf16.msra.mxu1 %v1040_v62  ;;  %v1046_v2 = vpack.c.bf16 %v357_v0, %v355_v1 }
  0xc0   : > { %1042 = vmatprep.subr.bf16.mxu1 %v1139_v30 }
  0xc3   : > { %1044 = vmatpush3.bf16.msra.mxu1 %v1043_v63 }
  0xc4   : > { %1045 = vmatprep.subr.bf16.mxu1 %v1139_v30 }
  0xc7   : > { %1047 = vmatpush3.bf16.msra.mxu1 %v1046_v2 }
  0xca   : > { %994 = vmatmul.mubr.msk.f32.vlgmr.msra.gmra.mrb[2].mxu1 %vm367_vm1, %v358_v59 }
 0x18d   : > { %v437_v4 = vpop.f32.mrb[0].mxu1 }
 0x18e   : > { %v976_v5 = vpop.f32.mrb[1].mxu1  ;;  %v441_v10 = vmax.f32 %v437_v4, 0.0 }
 0x19d   : > { %v508_v6 = vpop.f32.mrb[2].mxu1 }
 0x19e   : > { %v512_v7 = vmax.f32 %v508_v6, 0.0  ;;  %v995_v8 = vpop.f32.mrb[3].mxu1 }
 0x1a0   : > { %996 = vmatprep.subr.msk.mxu0 %vm538_vm3, %v512_v7 }
 0x1a1   : > { %997 = vmatpush3.msk.msra.mxu0 %vm538_vm3, %v512_v7 }
 0x1a2   : > { %999 = vmatmul.mubr.msk.f32.vlgmr.msra.gmra.mrb[0].mxu0 %vm513_vm2, %v360_v9  ;;  %1010 = vmatprep.subr.msk.mxu0 %vm538_vm3, %v441_v10 }
 0x1a3   : > { %1011 = vmatpush3.msk.msra.mxu0 %vm538_vm3, %v441_v10  ;;  %1001 = vmatprep.mubr.msk.f32.mxu0 %vm513_vm2, %v361_v11 }
 0x1a6   : > { %1002 = vmatmul.mubr.msk.f32.gmra.mrb[2].mxu0 %vm513_vm2, %v362_v12 }
 0x1a7   : > { %1004 = vmatprep.mubr.msk.f32.mxu0 %vm513_vm2, %v363_v13 }
 0x1aa   : > { %1005 = vmatmul.mubr.msk.f32.gmra.mrb[4].mxu0 %vm513_vm2, %v364_v14 }
 0x1ab   : > { %1007 = vmatprep.mubr.msk.f32.mxu0 %vm513_vm2, %v365_v15 }
 0x1ae   : > { %1008 = vmatmul.mubr.msk.f32.gmra.mrb[6].mxu0 %vm513_vm2, %v366_v16 }
 0x1af   : > { %1012 = vmatprep.mubr.msk.f32.mxu0 %vm513_vm2, %v359_v3 }
 0x1b2   : > { %1013 = vmatmul.mubr.msk.f32.vlgmr.msra.gmra.mrb[0].mxu0 %vm513_vm2, %v360_v9 }
 0x1b3   : > { %1015 = vmatprep.mubr.msk.f32.mxu0 %vm513_vm2, %v361_v11 }
 0x1b6   : > { %1016 = vmatmul.mubr.msk.f32.gmra.mrb[2].mxu0 %vm513_vm2, %v362_v12 }
 0x1b7   : > { %1018 = vmatprep.mubr.msk.f32.mxu0 %vm513_vm2, %v363_v13 }
 0x1ba   : > { %1019 = vmatmul.mubr.msk.f32.gmra.mrb[4].mxu0 %vm513_vm2, %v364_v14 }
 0x1bb   : > { %1021 = vmatprep.mubr.msk.f32.mxu0 %vm513_vm2, %v365_v15 }
 0x1be   : > { %1022 = vmatmul.mubr.msk.f32.gmra.mrb[6].mxu0 %vm513_vm2, %v366_v16 }
 0x285   : > { %v1014_v17 = vpop.f32.mrb[0].mxu0 }
 0x286   : > { %v911_v18 = vmul.f32 -1.442695, %v1014_v17  ;;  %v716_v19 = vpop.f32.mrb[1].mxu0 }
 0x287   : > { %v910_v20 = vmul.f32 -1.442695, %v716_v19 }
 0x288   : > { %1083 = vpow2.f32 %v911_v18 }
 0x289   : > { %1085 = vpow2.f32 %v910_v20  ;;  %v1017_v21 = vpop.f32.mrb[2].mxu0 }
 0x28a   : > { %v913_v22 = vmul.f32 -1.442695, %v1017_v21  ;;  %v726_v23 = vpop.f32.mrb[3].mxu0 }
 0x28b   : > { %v912_v24 = vmul.f32 -1.442695, %v726_v23 }
 0x28c   : > { %1087 = vpow2.f32 %v913_v22 }
 0x28d   : > { %1089 = vpow2.f32 %v912_v24  ;;  %v1020_v25 = vpop.f32.mrb[4].mxu0 }
 0x28e   : > { %v915_v26 = vmul.f32 -1.442695, %v1020_v25  ;;  %v736_v27 = vpop.f32.mrb[5].mxu0 }
 0x28f   : > { %v914_v28 = vmul.f32 -1.442695, %v736_v27 }
 0x290   : > { %1091 = vpow2.f32 %v915_v26 }
 0x291   : > { %1093 = vpow2.f32 %v914_v28  ;;  %v1023_v29 = vpop.f32.mrb[6].mxu0 }
 0x292   : > { %v1084_v30 = vpop.eup %1083  ;;  %v917_v31 = vmul.f32 -1.442695, %v1023_v29  ;;  %v746_v32 = vpop.f32.mrb[7].mxu0 }
 0x293   : > { %v1086_v33 = vpop.eup %1085  ;;  %v780_v34 = vadd.f32 1.0, %v1084_v30  ;;  %v916_v35 = vmul.f32 -1.442695, %v746_v32 }
 0x294   : > { %v779_v36 = vadd.f32 1.0, %v1086_v33  ;;  %1095 = vpow2.f32 %v917_v31 }
 0x295   : > { %1097 = vrcp.f32 %v780_v34 }
 0x296   : > { %v1088_v37 = vpop.eup %1087  ;;  %1099 = vrcp.f32 %v779_v36 }
 0x297   : > { %v1090_v38 = vpop.eup %1089  ;;  %v782_v39 = vadd.f32 1.0, %v1088_v37  ;;  %1101 = vpow2.f32 %v916_v35 }
 0x298   : > { %v781_v40 = vadd.f32 1.0, %v1090_v38 }
 0x299   : > { %1103 = vrcp.f32 %v782_v39 }
 0x29a   : > { %v1092_v41 = vpop.eup %1091  ;;  %1105 = vrcp.f32 %v781_v40 }
 0x29b   : > { %v1094_v42 = vpop.eup %1093  ;;  %v784_v43 = vadd.f32 1.0, %v1092_v41 }
 0x29c   : > { %v783_v44 = vadd.f32 1.0, %v1094_v42 }
 0x29d   : > { %1107 = vrcp.f32 %v784_v43 }
 0x29e   : > { %v1096_v45 = vpop.eup %1095  ;;  %1109 = vrcp.f32 %v783_v44 }
 0x29f   : > { %v1098_v46 = vpop.eup %1097  ;;  %v786_v47 = vadd.f32 1.0, %v1096_v45 }
 0x2a0   : > { %v1100_v48 = vpop.eup %1099  ;;  %805 = vst.msk [vmem:[%s198_s18 + $0x8] sm:$0xff] %vm803_vm4, %v1098_v46 }
 0x2a1   : > { %v1102_v49 = vpop.eup %1101  ;;  %804 = vst.msk [vmem:[%s198_s18] sm:$0xff] %vm803_vm4, %v1100_v48  ;;  %1111 = vrcp.f32 %v786_v47 }
 0x2a2   : > { %v785_v50 = vadd.f32 1.0, %v1102_v49 }
 0x2a3   : > { %v1104_v51 = vpop.eup %1103 }
 0x2a4   : > { %v1106_v52 = vpop.eup %1105  ;;  %807 = vst.msk [vmem:[%s198_s18 + $0x18] sm:$0xff] %vm803_vm4, %v1104_v51  ;;  %1113 = vrcp.f32 %v785_v50 }
 0x2a5   : > { %806 = vst.msk [vmem:[%s198_s18 + $0x10] sm:$0xff] %vm803_vm4, %v1106_v52 }
 0x2a7   : > { %v1108_v53 = vpop.eup %1107 }
 0x2a8   : > { %v1110_v54 = vpop.eup %1109  ;;  %809 = vst.msk [vmem:[%s198_s18 + $0x28] sm:$0xff] %vm803_vm4, %v1108_v53 }
 0x2a9   : > { %808 = vst.msk [vmem:[%s198_s18 + $0x20] sm:$0xff] %vm803_vm4, %v1110_v54 }
 0x2ab   : > { %v1112_v55 = vpop.eup %1111 }
 0x2ac   : > { %811 = vst.msk [vmem:[%s198_s18 + $0x38] sm:$0xff] %vm803_vm4, %v1112_v55 }
 0x2ae   : > { %v1114_v56 = vpop.eup %1113 }
 0x2af   : > { %810 = vst.msk [vmem:[%s198_s18 + $0x30] sm:$0xff] %vm803_vm4, %v1114_v56 }
 0x2b0 PF: > { %s13_s14 = sadd.s32 1, %s1137_s14   ;;  %s1258_s12 = smov %s1133_s13 }
 0x2b1   : > { %p10_p5 = scmp.ge.s32.totalorder %s13_s14, 4   ;;  %s1259_s13 = smov %s1261_s15 }
 0x2b3   :  { %12 = sbr.rel (!%p10_p5) target bundleno = 2 (0x2), region = 70 }

</bundles_post_ra>
